<compile_context>
chip_gen: v5e
topology: v5e:2x2
jax: 0.10.0
libtpu: 0.0.40
codegen_flags: <defaults>
</compile_context>

<pallas_src>
import functools

import jax
import jax.numpy as jnp
from jax.experimental import pallas as pl
from jax.experimental.pallas import tpu as pltpu

LANE = 128


def _pad_to(x, rows, cols):
    out = jnp.zeros((rows, cols), x.dtype)
    return out.at[: x.shape[0], : x.shape[1]].set(x)


def taggnn_qi_kernel(counts_ref, wt_ref, inv_len_ref, adj_ref,
                     w1_ref, b1_ref, w2_ref, b2_ref, out_ref):
    """Fused: embedding-bag (counts @ table) -> SAGE1 -> leaky_relu -> SAGE2.

    SAGEConv('mean'):  out = H @ W_self + (A_norm @ H) @ W_neigh + b
    restructured as    out = [H | A_norm @ H] @ [W_self ; W_neigh] + b
    (same FLOPs, K=2*Dp contraction, no slicing of the packed accumulator mid lane-tile).
    """
    a = adj_ref[...]                                            # (N, N) bf16 row-normalized adjacency

    # --- embedding bag on the MXU: sum_w counts[i,w] * E[w], scaled by 1/len ------------------
    h0 = jnp.dot(counts_ref[...], wt_ref[...],
                 preferred_element_type=jnp.float32)            # (N, Dp) f32
    h0 = (h0 * inv_len_ref[...]).astype(jnp.bfloat16)           # (N, Dp) bf16

    # --- gnn1: SAGEConv(mean) + leaky_relu ------------------------------------------------------
    ah0 = jnp.dot(a, h0, preferred_element_type=jnp.float32).astype(jnp.bfloat16)
    z1 = jnp.dot(jnp.concatenate([h0, ah0], axis=-1), w1_ref[...],
                 preferred_element_type=jnp.float32) + b1_ref[...]      # (N, Dp) f32
    h1 = jnp.where(z1 > 0, z1, 0.01 * z1).astype(jnp.bfloat16)          # F.leaky_relu, slope 0.01

    # --- gnn2: SAGEConv(mean) -------------------------------------------------------------------
    ah1 = jnp.dot(a, h1, preferred_element_type=jnp.float32).astype(jnp.bfloat16)
    out_ref[...] = jnp.dot(jnp.concatenate([h1, ah1], axis=-1), w2_ref[...],
                           preferred_element_type=jnp.float32) + b2_ref[...]


def prepare_taggnn_qi(params, adj_norm):
    """One-time prep (hoisted out of the per-call path): pad the feature dim to a lane-dense
    Dp=128, pack [W_self ; W_neigh] per layer, pre-cast MXU operands to bf16."""
    word_emb = params["word_emb"].astype(jnp.float32)           # (vocab+1, D)
    V1, D = word_emb.shape
    Dp = max(LANE, ((D + LANE - 1) // LANE) * LANE)
    Vp = ((V1 + LANE - 1) // LANE) * LANE

    bf = lambda x: x.astype(jnp.bfloat16)

    def pack(ws, wn):                                           # -> (2*Dp, Dp) bf16
        return bf(jnp.concatenate([_pad_to(ws.astype(jnp.float32), Dp, Dp),
                                   _pad_to(wn.astype(jnp.float32), Dp, Dp)], axis=0))

    return {
        "wt": bf(_pad_to(word_emb, Vp, Dp)),                    # (Vp, Dp)
        "adj": bf(adj_norm),                                    # (N, N)
        "w1": pack(params["w_self1"], params["w_neigh1"]),
        "b1": _pad_to(params["b1"].astype(jnp.float32), 1, Dp),
        "w2": pack(params["w_self2"], params["w_neigh2"]),
        "b2": _pad_to(params["b2"].astype(jnp.float32), 1, Dp),
    }


def taggnn_qi_forward(wids, lens, prep, *, vocab_size):
    """wids: (N, L) int32 word ids (pad id == vocab_size), lens: (N, 1) f32.
    Returns the padded (N, Dp) node embeddings; slice [:, :D] for the module's output."""
    wt, adj = prep["wt"], prep["adj"]
    w1, b1, w2, b2 = prep["w1"], prep["b1"], prep["w2"], prep["b2"]
    Vp, Dp = wt.shape
    N = adj.shape[0]

    # Word-id multiset -> per-node token-count matrix (exact embedding-bag as one MXU matmul).
    # Pad tokens are masked out, so the zero padding row of the table is not needed for correctness.
    # TODO(synk): for vocab sizes >> 1k replace this O(N*V) counts-matmul with a scalar-prefetch /
    # DMA row-gather of the word table (O(N*L*D)); at the demo V=50 the matmul form is cheaper.
    valid = (wids < vocab_size).astype(jnp.float32)
    counts = jnp.zeros((N, Vp), jnp.float32).at[jnp.arange(N)[:, None], wids].add(valid)
    counts = counts.astype(jnp.bfloat16)                        # small integers: exact in bf16

    inv_len = 1.0 / jnp.maximum(lens, 1.0)                      # safe reciprocal (guards len == 0)

    full = lambda shape: pl.BlockSpec(shape, lambda i: (0,) * len(shape))

    operands = (counts, wt, inv_len, adj, w1, b1, w2, b2)
    flops = 2 * N * (Vp * Dp + 2 * (N * Dp + 2 * Dp * Dp))
    bytes_accessed = sum(int(x.size) * x.dtype.itemsize for x in operands) + N * Dp * 4

    # TODO(synk): for large N, tile rows over a 'parallel' grid axis (one pallas_call per SAGE
    # layer, adjacency streamed in (TM, TK) blocks with an 'arbitrary' K axis) so the work
    # pipelines, shards across v7x's two TensorCores, and fits v7x's 64 MiB VMEM.
    return pl.pallas_call(
        taggnn_qi_kernel,
        out_shape=jax.ShapeDtypeStruct((N, Dp), jnp.float32),
        grid=(1,),
        in_specs=[
            full((N, Vp)),        # token counts
            full((Vp, Dp)),       # padded word-embedding table
            full((N, 1)),         # 1 / len
            full((N, N)),         # row-normalized adjacency
            full((2 * Dp, Dp)),   # [W_self1 ; W_neigh1]
            full((1, Dp)),        # b1
            full((2 * Dp, Dp)),   # [W_self2 ; W_neigh2]
            full((1, Dp)),        # b2
        ],
        out_specs=full((N, Dp)),
        compiler_params=pltpu.CompilerParams(dimension_semantics=("arbitrary",)),
        cost_estimate=pl.CostEstimate(flops=flops, transcendentals=0,
                                      bytes_accessed=bytes_accessed),
    )(*operands)


def reference_forward(wids, lens, adj_norm, params):
    """Pure-JAX f32 reference of TagGNN_QI.forward (padding row of the table is zero)."""
    h = jnp.sum(params["word_emb"][wids], axis=1) / lens

    def sage(h, ws, wn, b):
        return h @ ws + (adj_norm @ h) @ wn + b

    z1 = sage(h, params["w_self1"], params["w_neigh1"], params["b1"])
    h1 = jnp.where(z1 > 0, z1, 0.01 * z1)
    return sage(h1, params["w_self2"], params["w_neigh2"], params["b2"])


def make_params(key, vocab_size, emb_dim, initial_weight=0.1):
    ks = jax.random.split(key, 8)
    word_emb = initial_weight * jax.random.normal(ks[0], (vocab_size + 1, emb_dim), jnp.float32)
    word_emb = word_emb.at[vocab_size].set(0.0)                 # padding_idx = vocab_size -> zero
    lin = lambda k: (1.0 / jnp.sqrt(emb_dim)) * jax.random.normal(k, (emb_dim, emb_dim), jnp.float32)
    return {
        "word_emb": word_emb,
        "w_self1": lin(ks[1]), "w_neigh1": lin(ks[2]),
        "b1": 0.01 * jax.random.normal(ks[3], (1, emb_dim), jnp.float32),
        "w_self2": lin(ks[4]), "w_neigh2": lin(ks[5]),
        "b2": 0.01 * jax.random.normal(ks[6], (1, emb_dim), jnp.float32),
    }


if __name__ == "__main__":
    # Small synthetic problem consistent with the module:
    # n_query=8, n_item=16, n_tag=8 -> N=32 graph nodes; embedding_dim=32; vocab=50; max words L=8
    n_query, n_item, n_tag = 8, 16, 8
    N = n_query + n_item + n_tag
    D = 32
    vocab_size = 50
    L = 8

    key = jax.random.PRNGKey(0)
    k_param, k_wid, k_len, k_adj = jax.random.split(key, 4)

    params = make_params(k_param, vocab_size, D, initial_weight=0.1)

    # node word-id lists with padding (padding id == vocab_size)
    lens_i = jax.random.randint(k_len, (N,), 1, L + 1)                      # 1..L real tokens
    wids = jax.random.randint(k_wid, (N, L), 0, vocab_size).astype(jnp.int32)
    pos = jnp.arange(L)[None, :]
    wids = jnp.where(pos < lens_i[:, None], wids, vocab_size)               # pad tail
    lens = lens_i.astype(jnp.float32).reshape(-1, 1)                        # g.ndata['len'].view(-1,1)

    # random directed graph -> dense row-normalized adjacency (mean aggregator)
    adj = (jax.random.uniform(k_adj, (N, N)) < 0.2).astype(jnp.float32)
    adj = adj * (1.0 - jnp.eye(N))                                          # no self loops
    deg = jnp.sum(adj, axis=1, keepdims=True)
    adj_norm = jnp.where(deg > 0, adj / jnp.maximum(deg, 1.0), 0.0)

    prep = prepare_taggnn_qi(params, adj_norm)                              # one-time host prep
    fwd = jax.jit(functools.partial(taggnn_qi_forward, vocab_size=vocab_size))

    out_padded = fwd(wids, lens, prep)
    jax.block_until_ready(out_padded)
    out = out_padded[:, :D]                                                 # drop lane padding

    ref = reference_forward(wids, lens, adj_norm, params)
    assert out.shape == (N, D) and out.dtype == jnp.float32
    assert bool(jnp.all(jnp.isfinite(out)))
    max_err = float(jnp.max(jnp.abs(out - ref)))
    assert bool(jnp.allclose(out, ref, atol=3e-2, rtol=3e-2)), f"max_err={max_err}"
    print("KERNEL_OK")
</pallas_src>

<mosaic_0001>
module attributes {stable_mosaic.version = 11 : i64} {
  func.func @taggnn_qi_kernel(%arg0: i32, %arg1: memref<32x128xbf16, #tpu.memory_space<vmem>>, %arg2: memref<128x128xbf16, #tpu.memory_space<vmem>>, %arg3: memref<32x1xf32, #tpu.memory_space<vmem>>, %arg4: memref<32x32xbf16, #tpu.memory_space<vmem>>, %arg5: memref<256x128xbf16, #tpu.memory_space<vmem>>, %arg6: memref<1x128xf32, #tpu.memory_space<vmem>>, %arg7: memref<256x128xbf16, #tpu.memory_space<vmem>>, %arg8: memref<1x128xf32, #tpu.memory_space<vmem>>, %arg9: memref<32x128xf32, #tpu.memory_space<vmem>>) attributes {dimension_semantics = [#tpu.dimension_semantics<arbitrary>], iteration_bounds = array<i64: 1>, scalar_prefetch = 0 : i64, scratch_operands = 0 : i64, tpu.core_type = #tpu.core_type<tc>, window_params = [{pipeline_mode = #tpu.pipeline_mode<synchronous>, transform_indices = @transform_0, window_bounds = array<i64: 32, 128>}, {pipeline_mode = #tpu.pipeline_mode<synchronous>, transform_indices = @transform_1, window_bounds = array<i64: 128, 128>}, {pipeline_mode = #tpu.pipeline_mode<synchronous>, transform_indices = @transform_2, window_bounds = array<i64: 32, 1>}, {pipeline_mode = #tpu.pipeline_mode<synchronous>, transform_indices = @transform_3, window_bounds = array<i64: 32, 32>}, {pipeline_mode = #tpu.pipeline_mode<synchronous>, transform_indices = @transform_4, window_bounds = array<i64: 256, 128>}, {pipeline_mode = #tpu.pipeline_mode<synchronous>, transform_indices = @transform_5, window_bounds = array<i64: 1, 128>}, {pipeline_mode = #tpu.pipeline_mode<synchronous>, transform_indices = @transform_6, window_bounds = array<i64: 256, 128>}, {pipeline_mode = #tpu.pipeline_mode<synchronous>, transform_indices = @transform_7, window_bounds = array<i64: 1, 128>}, {pipeline_mode = #tpu.pipeline_mode<synchronous>, transform_indices = @transform_8, window_bounds = array<i64: 32, 128>}]} {
    %c0 = arith.constant 0 : index
    %c0_0 = arith.constant 0 : index
    %0 = vector.load %arg4[%c0, %c0_0] : memref<32x32xbf16, #tpu.memory_space<vmem>>, vector<32x32xbf16>
    %c0_1 = arith.constant 0 : index
    %c0_2 = arith.constant 0 : index
    %1 = vector.load %arg1[%c0_1, %c0_2] : memref<32x128xbf16, #tpu.memory_space<vmem>>, vector<32x128xbf16>
    %c0_3 = arith.constant 0 : index
    %c0_4 = arith.constant 0 : index
    %2 = vector.load %arg2[%c0_3, %c0_4] : memref<128x128xbf16, #tpu.memory_space<vmem>>, vector<128x128xbf16>
    %cst = arith.constant dense<0.000000e+00> : vector<32x128xf32>
    %3 = tpu.matmul %1, %2, %cst {dimension_numbers = #tpu.dot_dimension_numbers<[1], [0], [0], [1], [0, 0, 1, 1], [], []>} : vector<32x128xbf16>, vector<128x128xbf16>, vector<32x128xf32> -> vector<32x128xf32>
    %c0_5 = arith.constant 0 : index
    %c0_6 = arith.constant 0 : index
    %4 = vector.load %arg3[%c0_5, %c0_6] : memref<32x1xf32, #tpu.memory_space<vmem>>, vector<32x1xf32>
    %5 = vector.broadcast %4 : vector<32x1xf32> to vector<32x128xf32>
    %6 = arith.mulf %3, %5 : vector<32x128xf32>
    %7 = arith.truncf %6 : vector<32x128xf32> to vector<32x128xbf16>
    %cst_7 = arith.constant dense<0.000000e+00> : vector<32x128xf32>
    %8 = tpu.matmul %0, %7, %cst_7 {dimension_numbers = #tpu.dot_dimension_numbers<[1], [0], [0], [1], [0, 0, 1, 1], [], []>} : vector<32x32xbf16>, vector<32x128xbf16>, vector<32x128xf32> -> vector<32x128xf32>
    %9 = arith.truncf %8 : vector<32x128xf32> to vector<32x128xbf16>
    %10 = tpu.concatenate %7, %9 in 1 : vector<32x128xbf16>, vector<32x128xbf16> -> vector<32x256xbf16>
    %c0_8 = arith.constant 0 : index
    %c0_9 = arith.constant 0 : index
    %11 = vector.load %arg5[%c0_8, %c0_9] : memref<256x128xbf16, #tpu.memory_space<vmem>>, vector<256x128xbf16>
    %cst_10 = arith.constant dense<0.000000e+00> : vector<32x128xf32>
    %12 = tpu.matmul %10, %11, %cst_10 {dimension_numbers = #tpu.dot_dimension_numbers<[1], [0], [0], [1], [0, 0, 1, 1], [], []>} : vector<32x256xbf16>, vector<256x128xbf16>, vector<32x128xf32> -> vector<32x128xf32>
    %c0_11 = arith.constant 0 : index
    %c0_12 = arith.constant 0 : index
    %13 = vector.load %arg6[%c0_11, %c0_12] : memref<1x128xf32, #tpu.memory_space<vmem>>, vector<1x128xf32>
    %14 = vector.broadcast %13 : vector<1x128xf32> to vector<32x128xf32>
    %15 = arith.addf %12, %14 : vector<32x128xf32>
    %cst_13 = arith.constant 0.000000e+00 : f32
    %16 = vector.broadcast %cst_13 : f32 to vector<32x128xf32>
    %17 = arith.cmpf ogt, %15, %16 : vector<32x128xf32>
    %cst_14 = arith.constant 0.00999999977 : f32
    %18 = vector.broadcast %cst_14 : f32 to vector<32x128xf32>
    %19 = arith.mulf %18, %15 : vector<32x128xf32>
    %20 = arith.select %17, %15, %19 : vector<32x128xi1>, vector<32x128xf32>
    %21 = arith.truncf %20 : vector<32x128xf32> to vector<32x128xbf16>
    %cst_15 = arith.constant dense<0.000000e+00> : vector<32x128xf32>
    %22 = tpu.matmul %0, %21, %cst_15 {dimension_numbers = #tpu.dot_dimension_numbers<[1], [0], [0], [1], [0, 0, 1, 1], [], []>} : vector<32x32xbf16>, vector<32x128xbf16>, vector<32x128xf32> -> vector<32x128xf32>
    %23 = arith.truncf %22 : vector<32x128xf32> to vector<32x128xbf16>
    %24 = tpu.concatenate %21, %23 in 1 : vector<32x128xbf16>, vector<32x128xbf16> -> vector<32x256xbf16>
    %c0_16 = arith.constant 0 : index
    %c0_17 = arith.constant 0 : index
    %25 = vector.load %arg7[%c0_16, %c0_17] : memref<256x128xbf16, #tpu.memory_space<vmem>>, vector<256x128xbf16>
    %cst_18 = arith.constant dense<0.000000e+00> : vector<32x128xf32>
    %26 = tpu.matmul %24, %25, %cst_18 {dimension_numbers = #tpu.dot_dimension_numbers<[1], [0], [0], [1], [0, 0, 1, 1], [], []>} : vector<32x256xbf16>, vector<256x128xbf16>, vector<32x128xf32> -> vector<32x128xf32>
    %c0_19 = arith.constant 0 : index
    %c0_20 = arith.constant 0 : index
    %27 = vector.load %arg8[%c0_19, %c0_20] : memref<1x128xf32, #tpu.memory_space<vmem>>, vector<1x128xf32>
    %28 = vector.broadcast %27 : vector<1x128xf32> to vector<32x128xf32>
    %29 = arith.addf %26, %28 : vector<32x128xf32>
    %c0_21 = arith.constant 0 : index
    %c0_22 = arith.constant 0 : index
    %30 = vector.load %arg9[%c0_21, %c0_22] : memref<32x128xf32, #tpu.memory_space<vmem>>, vector<32x128xf32>
    tpu.vector_store %arg9[%c0_21, %c0_22], %29 {strides = array<i32>} : memref<32x128xf32, #tpu.memory_space<vmem>>, vector<32x128xf32>,
    return
  }
  func.func @transform_0(%arg0: i32) -> (i32, i32) {
    %c0_i32 = arith.constant 0 : i32
    %c0_i32_0 = arith.constant 0 : i32
    %c0_i32_1 = arith.constant 0 : i32
    return %c0_i32, %c0_i32_0 : i32, i32
  }
  func.func @transform_1(%arg0: i32) -> (i32, i32) {
    %c0_i32 = arith.constant 0 : i32
    %c0_i32_0 = arith.constant 0 : i32
    %c0_i32_1 = arith.constant 0 : i32
    return %c0_i32, %c0_i32_0 : i32, i32
  }
  func.func @transform_2(%arg0: i32) -> (i32, i32) {
    %c0_i32 = arith.constant 0 : i32
    %c0_i32_0 = arith.constant 0 : i32
    %c0_i32_1 = arith.constant 0 : i32
    return %c0_i32, %c0_i32_0 : i32, i32
  }
  func.func @transform_3(%arg0: i32) -> (i32, i32) {
    %c0_i32 = arith.constant 0 : i32
    %c0_i32_0 = arith.constant 0 : i32
    %c0_i32_1 = arith.constant 0 : i32
    return %c0_i32, %c0_i32_0 : i32, i32
  }
  func.func @transform_4(%arg0: i32) -> (i32, i32) {
    %c0_i32 = arith.constant 0 : i32
    %c0_i32_0 = arith.constant 0 : i32
    %c0_i32_1 = arith.constant 0 : i32
    return %c0_i32, %c0_i32_0 : i32, i32
  }
  func.func @transform_5(%arg0: i32) -> (i32, i32) {
    %c0_i32 = arith.constant 0 : i32
    %c0_i32_0 = arith.constant 0 : i32
    %c0_i32_1 = arith.constant 0 : i32
    return %c0_i32, %c0_i32_0 : i32, i32
  }
  func.func @transform_6(%arg0: i32) -> (i32, i32) {
    %c0_i32 = arith.constant 0 : i32
    %c0_i32_0 = arith.constant 0 : i32
    %c0_i32_1 = arith.constant 0 : i32
    return %c0_i32, %c0_i32_0 : i32, i32
  }
  func.func @transform_7(%arg0: i32) -> (i32, i32) {
    %c0_i32 = arith.constant 0 : i32
    %c0_i32_0 = arith.constant 0 : i32
    %c0_i32_1 = arith.constant 0 : i32
    return %c0_i32, %c0_i32_0 : i32, i32
  }
  func.func @transform_8(%arg0: i32) -> (i32, i32) {
    %c0_i32 = arith.constant 0 : i32
    %c0_i32_0 = arith.constant 0 : i32
    %c0_i32_1 = arith.constant 0 : i32
    return %c0_i32, %c0_i32_0 : i32, i32
  }
}

</mosaic_0001>

<bundles_post_ra>
// kernel: taggnn_qi_forward.1
= control target key start
LH: loop header
LB: loop body
LE: loop exit
PB: predicated region body
PF: predicated region fallthrough
CT: control target
= control target key end

     0   :  { %v929_v2 = vmov 0   ;;  %s1143_s0 = inlined_call_operand.vmem [shape: bf16[32,128], index: 0, kind: input, shape index: {}]   ;;  %s1144_s1 = inlined_call_operand.vmem [shape: bf16[128,128], index: 1, kind: input, shape index: {}]   ;;  %s1145_s2 = inlined_call_operand.vmem [shape: f32[32,1], index: 2, kind: input, shape index: {}]   ;;  %s1146_s3 = inlined_call_operand.vmem [shape: bf16[32,32], index: 3, kind: input, shape index: {}]   ;;  %s1147_s4 = inlined_call_operand.vmem [shape: bf16[256,128], index: 4, kind: input, shape index: {}]   ;;  %s1148_s5 = inlined_call_operand.vmem [shape: f32[1,128], index: 5, kind: input, shape index: {}]   ;;  %s1149_s6 = inlined_call_operand.vmem [shape: bf16[256,128], index: 6, kind: input, shape index: {}]   ;;  %s1150_s7 = inlined_call_operand.vmem [shape: f32[1,128], index: 7, kind: input, shape index: {}]   ;;  %s1151_s8 = inlined_call_operand.hbm [shape: f32[32,128], index: 8, kind: output, shape index: {}]  }
   0x1   :  { %v846_v0 = vld [vmem:[%s1144_s1 + $0x38] sm:$0xff]  ;;  %v845_v1 = vld [vmem:[%s1144_s1 + $0x30] sm:$0xff]  ;;  %900 = vset.pattern.permute.xlu1 %v929_v2  ;;  %v134_v3 = vld [vmem:[%s1145_s2] sm:$0xff]  ;;  %899 = vset.pattern.permute.xlu0 %v929_v2 }
   0x2   :  { %115 = vmatpush.bf16.msra.mxu0 %v846_v0  ;;  %140 = vperm.xlu1 %900, %v134_v3  }
   0x3   :  { %13 = vsyncpa [#allocation3], 0  ;;  %v844_v4 = vld [vmem:[%s1144_s1 + $0x28] sm:$0xff]  ;;  %v843_v5 = vld [vmem:[%s1144_s1 + $0x20] sm:$0xff]  ;;  %vm188_vm0 = vcmask 261120   ;;  %s931_s28 = smov 128  }
   0x4   :  { %v842_v6 = vld [vmem:[%s1144_s1 + $0x18] sm:$0xff]  ;;  %v136_v7 = vld [vmem:[%s1145_s2 + $0x10] sm:$0xff]  ;;  %v135_v8 = vld [vmem:[%s1145_s2 + $0x8] sm:$0xff]  ;;  %s932_s29 = smov 8  }
   0x5   :  { %v841_v9 = vld [vmem:[%s1144_s1 + $0x10] sm:$0xff]  ;;  %150 = vperm.xlu0 %899, %v136_v7   ;;  %v854_v10 = vld [vmem:[%s1147_s4 + $0x38] sm:$0xff]  ;;  %v840_v12 = vld [vmem:[%s1144_s1 + $0x8] sm:$0xff] }
   0x6   :  { %116 = vmatpush.bf16.msra.mxu0 %v845_v1  ;;  %362 = vmatpush.bf16.msra.mxu2 %v854_v10  ;;  %v853_v11 = vld [vmem:[%s1147_s4 + $0x30] sm:$0xff]  ;;  %v137_v13 = vld [vmem:[%s1145_s2 + $0x18] sm:$0xff]  ;;  %v852_v14 = vld [vmem:[%s1147_s4 + $0x28] sm:$0xff] }
   0x7   :  { %v839_v15 = vld [vmem:[%s1144_s1] sm:$0xff]  ;;  %v838_v18 = vld [vmem:[%s1143_s0 + $0x8] sm:$0xff]  ;;  %v850_v19 = vld [vmem:[%s1147_s4 + $0x18] sm:$0xff] }
   0x8   :  { %v851_v16 = vld [vmem:[%s1147_s4 + $0x20] sm:$0xff]  ;;  %v849_v20 = vld [vmem:[%s1147_s4 + $0x10] sm:$0xff]  ;;  %v848_v21 = vld [vmem:[%s1147_s4 + $0x8] sm:$0xff] }
   0x9   :  { %v837_v17 = vld [vmem:[%s1143_s0] sm:$0xff]  ;;  %v1054_v46 = vld [vmem:[%s1146_s3 + $0x8] sm:$0xff]  ;;  %v862_v47 = vld [vmem:[%s1147_s4 + $0x78] sm:$0xff]  ;;  %s930_s0 = smov [#allocation2]  }
   0xa   :  { %117 = vmatpush.bf16.msra.mxu0 %v844_v4  ;;  %145 = vperm.xlu1 %900, %v135_v8   ;;  %v847_v22 = vld [vmem:[%s1147_s4] sm:$0xff]  ;;  %v861_v48 = vld [vmem:[%s1147_s4 + $0x70] sm:$0xff]  ;;  %v860_v49 = vld [vmem:[%s1147_s4 + $0x68] sm:$0xff]  ;;  %s641_s25 = sshll.u32 %s930_s0, 4  ;;  %s642_s25 = int_to_ptr.vmem [resolvable:$true] %s641_s25 }
   0xb   :  { %363 = vmatpush.bf16.msra.mxu2 %v853_v11  ;;  %v1047_v45 = vld [vmem:[%s1146_s3] sm:$0xff]  ;;  %381 = vmatpush.bf16.msra.mxu3 %v862_v47  ;;  %v858_v51 = vld [vmem:[%s1147_s4 + $0x58] sm:$0xff]  ;;  %v857_v52 = vld [vmem:[%s1147_s4 + $0x50] sm:$0xff] }
   0xc   :  { %v859_v50 = vld [vmem:[%s1147_s4 + $0x60] sm:$0xff]  ;;  %v856_v53 = vld [vmem:[%s1147_s4 + $0x48] sm:$0xff]  ;;  %v870_v55 = vld [vmem:[%s1149_s6 + $0x38] sm:$0xff] }
   0xd   :  { %155 = vperm.xlu0 %899, %v137_v13   ;;  %v855_v54 = vld [vmem:[%s1147_s4 + $0x40] sm:$0xff]  ;;  %v869_v57 = vld [vmem:[%s1149_s6 + $0x30] sm:$0xff]  ;;  %v868_v58 = vld [vmem:[%s1149_s6 + $0x28] sm:$0xff] }
   0xe   :  { %118 = vmatpush.bf16.msra.mxu0 %v843_v5  ;;  %v867_v8 = vld [vmem:[%s1149_s6 + $0x20] sm:$0xff]  ;;  %v865_v10 = vld [vmem:[%s1149_s6 + $0x10] sm:$0xff]  ;;  %v864_v11 = vld [vmem:[%s1149_s6 + $0x8] sm:$0xff] }
   0xf   :  { %364 = vmatpush.bf16.msra.mxu2 %v852_v14  ;;  %382 = vmatpush.bf16.msra.mxu3 %v861_v48  ;;  %v901_v14 = vld [vmem:[%s1148_s5] ss:$0 sm:$0xff] }
  0x12   :  { %119 = vmatpush.bf16.msra.mxu0 %v842_v6 }
  0x13   :  { %365 = vmatpush.bf16.msra.mxu2 %v851_v16  ;;  %383 = vmatpush.bf16.msra.mxu3 %v860_v49 }
  0x16   :  { %120 = vmatpush.bf16.msra.mxu0 %v841_v9  ;;  %v866_v9 = vld [vmem:[%s1149_s6 + $0x18] sm:$0xff] }
  0x17   :  { %366 = vmatpush.bf16.msra.mxu2 %v850_v19  ;;  %384 = vmatpush.bf16.msra.mxu3 %v859_v50  ;;  %v878_v50 = vld [vmem:[%s1149_s6 + $0x78] sm:$0xff] }
  0x1a   :  { %121 = vmatpush.bf16.msra.mxu0 %v840_v12  ;;  %v863_v12 = vld [vmem:[%s1149_s6] sm:$0xff] }
  0x1b   :  { %367 = vmatpush.bf16.msra.mxu2 %v849_v20  ;;  %385 = vmatpush.bf16.msra.mxu3 %v858_v51  ;;  %v877_v51 = vld [vmem:[%s1149_s6 + $0x70] sm:$0xff] }
  0x1e   :  { %122 = vmatpush.bf16.msra.mxu0 %v839_v15 }
  0x1f   :  { %368 = vmatpush.bf16.msra.mxu2 %v848_v21  ;;  %386 = vmatpush.bf16.msra.mxu3 %v857_v52  ;;  %v876_v52 = vld [vmem:[%s1149_s6 + $0x68] sm:$0xff] }
  0x21   :  { %123 = vmatmul.bf16.vlgmr.msra.gmra.mxu0 %v837_v17 }
  0x22   :  { %595 = vmatpush.bf16.msrb.mxu0 %v870_v55 }
  0x23   :  { %369 = vmatpush.bf16.msra.mxu2 %v847_v22  ;;  %387 = vmatpush.bf16.msra.mxu3 %v856_v53  ;;  %v873_v53 = vld [vmem:[%s1149_s6 + $0x50] sm:$0xff] }
  0x26   :  { %596 = vmatpush.bf16.msrb.mxu0 %v869_v57 }
  0x27   :  { %388 = vmatpush.bf16.msra.mxu3 %v855_v54  ;;  %887 = vmatpush.bf16.msrb.mxu2 %v878_v50  ;;  %v872_v54 = vld [vmem:[%s1149_s6 + $0x48] sm:$0xff] }
  0x2a   :  { %597 = vmatpush.bf16.msrb.mxu0 %v868_v58 }
  0x2b   :  { %879 = vmatpush.bf16.msrb.mxu3 %v870_v55  ;;  %888 = vmatpush.bf16.msrb.mxu2 %v877_v51  ;;  %v871_v55 = vld [vmem:[%s1149_s6 + $0x40] sm:$0xff] }
  0x2e   :  { %598 = vmatpush.bf16.msrb.mxu0 %v867_v8 }
  0x2f   :  { %880 = vmatpush.bf16.msrb.mxu3 %v869_v57  ;;  %889 = vmatpush.bf16.msrb.mxu2 %v876_v52 }
  0x31   :  { %128 = vmatmul.bf16.gmra.mxu0 %v838_v18 }
  0x32   :  { %599 = vmatpush.bf16.msrb.mxu0 %v866_v9 }
  0x33   :  { %881 = vmatpush.bf16.msrb.mxu3 %v868_v58 }
  0x36   :  { %600 = vmatpush.bf16.msrb.mxu0 %v865_v10 }
  0x37   :  { %882 = vmatpush.bf16.msrb.mxu3 %v867_v8 }
  0x3a   :  { %601 = vmatpush.bf16.msrb.mxu0 %v864_v11 }
  0x3b   :  { %883 = vmatpush.bf16.msrb.mxu3 %v866_v9 }
  0x3e   :  { %602 = vmatpush.bf16.msrb.mxu0 %v863_v12 }
  0x3f   :  { %884 = vmatpush.bf16.msrb.mxu3 %v865_v10 }
  0x43   :  { %885 = vmatpush.bf16.msrb.mxu3 %v864_v11 }
  0x47   :  { %886 = vmatpush.bf16.msrb.mxu3 %v863_v12 }
  0x74   :  { %v141_v23 = vpop.permute.xlu1 %140 }
  0x77   :  { %v151_v33 = vpop.permute.xlu0 %150 }
  0x7c   :  { %v146_v26 = vpop.permute.xlu1 %145 }
  0x7f   :  { %v156_v37 = vpop.permute.xlu0 %155 }
  0x9e   :  { %v124_v24 = vpop.f32.mrf.mxu0 }
  0x9f   :  { %v158_v25 = vmul.f32 %v141_v23, %v124_v24 }
  0xa1   :  { %v162_v28 = vpack.c.bf16 %v158_v25, %v158_v25 }
  0xa3   :  { %v180_v31 = vunpack.c.l.b16 %v162_v28 }
  0xa6   :  { %v126_v27 = vpop.f32.mrf.mxu0 }
  0xa7   :  { %v159_v29 = vmul.f32 %v146_v26, %v126_v27 }
  0xa9   :  { %v163_v30 = vpack.c.bf16 %v159_v29, %v159_v29 }
  0xab   :  { %v181_v32 = vunpack.c.l.b16 %v163_v30 }
  0xad   :  { %v184_v34 = vpack.c.b16 %v181_v32, %v180_v31 }
  0xae   :  { %v129_v35 = vpop.f32.mrf.mxu0 }
  0xaf   :  { %370 = vmatmul.bf16.vlgmr.msra.gmra.mxu2 %v184_v34  ;;  %v160_v36 = vmul.f32 %v151_v33, %v129_v35 }
  0xb1   :  { %v164_v39 = vpack.c.bf16 %v160_v36, %v160_v36 }
  0xb3   :  { %v182_v42 = vunpack.c.l.b16 %v164_v39 }
  0xb6   :  { %v131_v38 = vpop.f32.mrf.mxu0 }
  0xb7   :  { %v161_v40 = vmul.f32 %v156_v37, %v131_v38 }
  0xb9   :  { %v165_v41 = vpack.c.bf16 %v161_v40, %v161_v40 }
  0xbb   :  { %v183_v43 = vunpack.c.l.b16 %v165_v41 }
  0xbd   :  { %v185_v44 = vpack.c.b16 %v183_v43, %v182_v42 }
  0xbf   :  { %201 = vmatpush.bf16.msra.mxu1 %v185_v44  ;;  %375 = vmatmul.bf16.gmra.mxu2 %v185_v44 }
  0xc3   :  { %202 = vmatpush.bf16.msra.mxu1 %v184_v34 }
  0xc6   :  { %703 = vmatmul.msk.bf16.vlgmr.msra.gmra.mxu1 %vm188_vm0, %v1047_v45 }
  0xd6   :  { %704 = vmatmul.msk.bf16.gmra.mxu1 %vm188_vm0, %v1054_v46 }
 0x132   :  { %v371_v13 = vpop.f32.mrf.mxu2 }
 0x133   :  { %v372_v15 = vadd.f32 %v901_v14, %v371_v13 }
 0x13a   :  { %v373_v16 = vpop.f32.mrf.mxu2 }
 0x13b   :  { %v374_v20 = vadd.f32 %v901_v14, %v373_v16 }
 0x142   :  { %v376_v24 = vpop.f32.mrf.mxu2 }
 0x143   :  { %v204_v56 = vpop.f32.mrf.mxu1  ;;  %v377_v29 = vadd.f32 %v901_v14, %v376_v24 }
 0x144   :  { %v214_v59 = vpack.c.bf16 %v204_v56, %v204_v56 }
 0x146   :  { %v222_v62 = vunpack.c.l.b16 %v214_v59 }
 0x14a   :  { %v378_v35 = vpop.f32.mrf.mxu2 }
 0x14b   :  { %v206_v60 = vpop.f32.mrf.mxu1  ;;  %v379_v37 = vadd.f32 %v901_v14, %v378_v35 }
 0x14c   :  { %v215_v61 = vpack.c.bf16 %v206_v60, %v206_v60 }
 0x14e   :  { %v223_v63 = vunpack.c.l.b16 %v215_v61 }
 0x150   :  { %v226_v0 = vpack.c.b16 %v223_v63, %v222_v62 }
 0x152   :  { %389 = vmatmul.bf16.vlgmr.msra.gmra.mxu3 %v226_v0 }
 0x153   :  { %v209_v1 = vpop.f32.mrf.mxu1 }
 0x154   :  { %v216_v2 = vpack.c.bf16 %v209_v1, %v209_v1 }
 0x156   :  { %v224_v5 = vunpack.c.l.b16 %v216_v2 }
 0x15b   :  { %v211_v3 = vpop.f32.mrf.mxu1 }
 0x15c   :  { %v217_v4 = vpack.c.bf16 %v211_v3, %v211_v3 }
 0x15e   :  { %v225_v6 = vunpack.c.l.b16 %v217_v4 }
 0x160   :  { %v227_v7 = vpack.c.b16 %v225_v6, %v224_v5 }
 0x162   :  { %394 = vmatmul.bf16.gmra.mxu3 %v227_v7  ;;  %v902_v7 = vld [vmem:[%s1150_s7] ss:$0 sm:$0xff]  ;;  %s643_s7 = sshll.u32 %s1151_s8, 4  ;;  %s644_s7 = int_to_ptr.hbm [resolvable:$true] %s643_s7 }
 0x1d5   :  { %v390_v17 = vpop.f32.mrf.mxu3 }
 0x1d6   :  { %v391_v18 = vadd.f32 %v390_v17, %v372_v15 }
 0x1d8   :  { %v404_v19 = vmul.f32 0.01, %v391_v18  ;;  %vm400_vm1 = vcmp.gt.f32.partialorder %v391_v18, 0.0 }
 0x1da   :  { %v408_v22 = vsel %vm400_vm1, %v391_v18, %v404_v19 }
 0x1db   :  { %v412_v26 = vpack.c.bf16 %v408_v22, %v408_v22 }
 0x1dd   :  { %v392_v21 = vpop.f32.mrf.mxu3  ;;  %v420_v30 = vunpack.c.l.b16 %v412_v26 }
 0x1de   :  { %v393_v23 = vadd.f32 %v392_v21, %v374_v20 }
 0x1e0   :  { %vm401_vm2 = vcmp.gt.f32.partialorder %v393_v23, 0.0  ;;  %v405_v25 = vmul.f32 0.01, %v393_v23 }
 0x1e2   :  { %v409_v27 = vsel %vm401_vm2, %v393_v23, %v405_v25 }
 0x1e3   :  { %v413_v28 = vpack.c.bf16 %v409_v27, %v409_v27 }
 0x1e5   :  { %v421_v31 = vunpack.c.l.b16 %v413_v28  ;;  %v395_v32 = vpop.f32.mrf.mxu3 }
 0x1e6   :  { %v396_v33 = vadd.f32 %v395_v32, %v377_v29 }
 0x1e7   :  { %v424_v34 = vpack.c.b16 %v421_v31, %v420_v30 }
 0x1e8   :  { %v406_v36 = vmul.f32 0.01, %v396_v33  ;;  %vm402_vm3 = vcmp.gt.f32.partialorder %v396_v33, 0.0 }
 0x1e9   :  { %603 = vmatmul.bf16.vlgmr.msrb.gmra.mxu0 %v424_v34 }
 0x1ea   :  { %v410_v40 = vsel %vm402_vm3, %v396_v33, %v406_v36 }
 0x1eb   :  { %v414_v42 = vpack.c.bf16 %v410_v40, %v410_v40 }
 0x1ed   :  { %v397_v38 = vpop.f32.mrf.mxu3  ;;  %v422_v47 = vunpack.c.l.b16 %v414_v42 }
 0x1ee   :  { %v398_v39 = vadd.f32 %v397_v38, %v379_v37 }
 0x1f0   :  { %vm403_vm4 = vcmp.gt.f32.partialorder %v398_v39, 0.0  ;;  %v407_v41 = vmul.f32 0.01, %v398_v39 }
 0x1f2   :  { %v411_v43 = vsel %vm403_vm4, %v398_v39, %v407_v41 }
 0x1f3   :  { %v415_v44 = vpack.c.bf16 %v411_v43, %v411_v43 }
 0x1f5   :  { %v423_v48 = vunpack.c.l.b16 %v415_v44 }
 0x1f7   :  { %v425_v49 = vpack.c.b16 %v423_v48, %v422_v47 }
 0x1f9   :  { %434 = vmatpush.bf16.msrb.mxu1 %v425_v49  ;;  %608 = vmatmul.bf16.vlgmr.msrb.gmra.mxu3 %v425_v49 }
 0x1fd   :  { %435 = vmatpush.bf16.msrb.mxu1 %v424_v34 }
 0x200   :  { %769 = vmatmul.msk.bf16.vlgmr.msrb.gmra.mxu1 %vm188_vm0, %v1047_v45  ;;  %v875_v45 = vld [vmem:[%s1149_s6 + $0x60] sm:$0xff] }
 0x201   :  { %614 = vmatpush.bf16.msra.mxu1 %v878_v50  ;;  %890 = vmatpush.bf16.msrb.mxu2 %v875_v45 }
 0x205   :  { %615 = vmatpush.bf16.msra.mxu1 %v877_v51 }
 0x209   :  { %616 = vmatpush.bf16.msra.mxu1 %v876_v52 }
 0x20d   :  { %617 = vmatpush.bf16.msra.mxu1 %v875_v45 }
 0x210   :  { %770 = vmatmul.msk.bf16.gmra.mxu1 %vm188_vm0, %v1054_v46  ;;  %v874_v46 = vld [vmem:[%s1149_s6 + $0x58] sm:$0xff] }
 0x211   :  { %618 = vmatpush.bf16.msra.mxu1 %v874_v46  ;;  %891 = vmatpush.bf16.msrb.mxu2 %v874_v46 }
 0x215   :  { %619 = vmatpush.bf16.msra.mxu1 %v873_v53  ;;  %892 = vmatpush.bf16.msrb.mxu2 %v873_v53 }
 0x219   :  { %620 = vmatpush.bf16.msra.mxu1 %v872_v54  ;;  %893 = vmatpush.bf16.msrb.mxu2 %v872_v54 }
 0x21d   :  { %621 = vmatpush.bf16.msra.mxu1 %v871_v55  ;;  %894 = vmatpush.bf16.msrb.mxu2 %v871_v55 }
 0x266   :  { %v604_v6 = vpop.f32.mrf.mxu0 }
 0x267   :  { %v605_v8 = vadd.f32 %v902_v7, %v604_v6 }
 0x26e   :  { %v606_v11 = vpop.f32.mrf.mxu0 }
 0x26f   :  { %v607_v12 = vadd.f32 %v902_v7, %v606_v11 }
 0x27c   :  { %v609_v15 = vpop.f32.mrf.mxu3 }
 0x27d   :  { %v437_v56 = vpop.f32.mrf.mxu1  ;;  %v610_v16 = vadd.f32 %v902_v7, %v609_v15 }
 0x27e   :  { %v447_v57 = vpack.c.bf16 %v437_v56, %v437_v56 }
 0x280   :  { %v455_v60 = vunpack.c.l.b16 %v447_v57 }
 0x284   :  { %v611_v19 = vpop.f32.mrf.mxu3 }
 0x285   :  { %v439_v58 = vpop.f32.mrf.mxu1  ;;  %v612_v20 = vadd.f32 %v902_v7, %v611_v19 }
 0x286   :  { %v448_v59 = vpack.c.bf16 %v439_v58, %v439_v58 }
 0x288   :  { %v456_v61 = vunpack.c.l.b16 %v448_v59 }
 0x28a   :  { %v459_v62 = vpack.c.b16 %v456_v61, %v455_v60 }
 0x28c   :  { %622 = vmatmul.bf16.vlgmr.msra.gmra.mxu1 %v459_v62 }
 0x28d   :  { %v442_v63 = vpop.f32.mrf.mxu1 }
 0x28e   :  { %v449_v0 = vpack.c.bf16 %v442_v63, %v442_v63 }
 0x290   :  { %v457_v3 = vunpack.c.l.b16 %v449_v0 }
 0x295   :  { %v444_v1 = vpop.f32.mrf.mxu1 }
 0x296   :  { %v450_v2 = vpack.c.bf16 %v444_v1, %v444_v1 }
 0x298   :  { %v458_v4 = vunpack.c.l.b16 %v450_v2 }
 0x29a   :  { %v460_v5 = vpack.c.b16 %v458_v4, %v457_v3 }
 0x29c   :  { %627 = vmatmul.bf16.vlgmr.msrb.gmra.mxu2 %v460_v5 }
 0x309   :  { %v623_v9 = vpop.f32.mrf.mxu1 }
 0x30a   :  { %v624_v10 = vadd.f32 %v623_v9, %v605_v8 }
 0x30c   :  { %633 = vst [vmem:[#allocation2] sm:$0xff] %v624_v10 }
 0x311   :  { %v625_v13 = vpop.f32.mrf.mxu1 }
 0x312   :  { %v626_v14 = vadd.f32 %v625_v13, %v607_v12 }
 0x314   :  { %634 = vst [vmem:[#allocation2 + $0x8] sm:$0xff] %v626_v14 }
 0x31f   :  { %v628_v17 = vpop.f32.mrf.mxu2 }
 0x320   :  { %v629_v18 = vadd.f32 %v628_v17, %v610_v16 }
 0x322   :  { %635 = vst [vmem:[#allocation2 + $0x10] sm:$0xff] %v629_v18 }
 0x327   :  { %v630_v21 = vpop.f32.mrf.mxu2 }
 0x328   :  { %v631_v22 = vadd.f32 %v630_v21, %v612_v20 }
 0x32a   :  { %636 = vst [vmem:[#allocation2 + $0x18] sm:$0xff] %v631_v22 }
 0x32b   :  { %649 = dma.vmem_to_hbm [thread:$0]  %s642_s25, 512, %s644_s7, [#allocation3], %s931_s28, %s931_s28, %s932_s29  }
 0x32c   :  { %927 = dma.done.wait [#allocation3], 512  }
 0x32d   :  { %928 = vsyncadd [#allocation3], 4294966784 }
 0x32e   :  { %654 = vsyncpa [#allocation3], 1 }

</bundles_post_ra>
